<compile_context>
chip_gen: v5e
topology: v5e:2x2
jax: 0.10.0
libtpu: 0.0.40
codegen_flags: <defaults>
</compile_context>

<pallas_src>
import jax
import jax.numpy as jnp
from jax.experimental import pallas as pl
from jax.experimental.pallas import tpu as pltpu

_LANE = 128
_U8_SUBLANES = 32


def _normalize_kernel(scale_ref, shift_ref, img_ref, out_ref):
    # scale_ref / shift_ref: (rb, 1) f32, broadcast along the lane axis
    # img_ref:               (rb, tp) uint8 pixel tile
    # out_ref:               (rb, tp) out_dtype tile
    x = img_ref[...].astype(jnp.float32)
    out_ref[...] = (x * scale_ref[...] - shift_ref[...]).astype(out_ref.dtype)


def _choose_tiling(R, P, bytes_per_out, tile_budget_bytes):
    """Pick (row_block, pixel_block) for the lane-dense (R, P) slab."""
    per_elem = 1 + bytes_per_out                       # u8 in + out bytes per element
    max_rows = tile_budget_bytes // max(P * per_elem, 1)
    if max_rows >= R:
        rb, tp = R, P                                  # whole slab fits one block
    elif max_rows >= _U8_SUBLANES:
        rb = (max_rows // _U8_SUBLANES) * _U8_SUBLANES
        tp = P                                         # contiguous full-row DMA runs
    else:
        rb = R if R < _U8_SUBLANES else _U8_SUBLANES
        tp = max(_LANE, (tile_budget_bytes // (rb * per_elem)) // _LANE * _LANE)
        tp = min(tp, P)
    # Guarantee >=2 grid steps when the data allows (v7x has 2 TensorCores).
    if pl.cdiv(R, rb) * pl.cdiv(P, tp) < 2:
        if R > _U8_SUBLANES:
            rb = max(_U8_SUBLANES, (pl.cdiv(R, 2) // _U8_SUBLANES) * _U8_SUBLANES)
        elif P >= 2 * _LANE:
            tp = max(_LANE, (pl.cdiv(P, 2) // _LANE) * _LANE)
    return rb, tp


def normalize_to_tensor(img_u8, mean, std, *, out_dtype=jnp.float32,
                        tile_budget_bytes=8 * 1024 * 1024):
    """out[n,c,h,w] = float(img[n,c,h,w]) / (255*std[c]) - mean[c]/std[c]

    img_u8: uint8 (N, C, H, W);  mean, std: (C,) floats.
    out_dtype=jnp.bfloat16 is the fast path when the consumer accepts it
    (f32 writes are 4 of the 5 HBM bytes per element).
    # TODO(synk): the PIL byte-buffer decode branch (pil_to_tensor) has no Pallas
    # equivalent; this kernel implements the tensor-input branch of forward().
    """
    N, C, H, W = img_u8.shape
    mean = jnp.asarray(mean, jnp.float32)
    std = jnp.asarray(std, jnp.float32)
    mul = (1.0 / (255.0 * std)).astype(jnp.float32)    # (C,)
    sub = (mean / std).astype(jnp.float32)             # (C,)

    # Lane-dense flattening: one row per (n, c), all H*W pixels on the lane axis.
    R = N * C
    P = H * W
    x = img_u8.reshape(R, P)
    scale = jnp.tile(mul, N).reshape(R, 1)             # row r = n*C + c -> mul[c]
    shift = jnp.tile(sub, N).reshape(R, 1)

    bytes_per_out = jnp.dtype(out_dtype).itemsize
    rb, tp = _choose_tiling(R, P, bytes_per_out, tile_budget_bytes)
    grid = (pl.cdiv(R, rb), pl.cdiv(P, tp))            # pixel axis innermost:
                                                       # scale/shift stay resident

    cost = pl.CostEstimate(
        flops=2 * R * P,
        transcendentals=0,
        bytes_accessed=R * P * (1 + bytes_per_out) + 2 * R * 4,
    )

    out2d = pl.pallas_call(
        _normalize_kernel,
        out_shape=jax.ShapeDtypeStruct((R, P), out_dtype),
        grid_spec=pltpu.PrefetchScalarGridSpec(
            num_scalar_prefetch=0,
            grid=grid,
            in_specs=[
                pl.BlockSpec((rb, 1), lambda i, j: (i, 0)),   # per-row scale
                pl.BlockSpec((rb, 1), lambda i, j: (i, 0)),   # per-row shift
                pl.BlockSpec((rb, tp), lambda i, j: (i, j)),  # uint8 pixels
            ],
            out_specs=pl.BlockSpec((rb, tp), lambda i, j: (i, j)),
        ),
        compiler_params=pltpu.CompilerParams(
            dimension_semantics=("parallel", "parallel"),     # shard across TCs
            vmem_limit_bytes=48 * 1024 * 1024,
        ),
        cost_estimate=cost,
    )(scale, shift, x)

    return out2d.reshape(N, C, H, W)


if __name__ == "__main__":
    key = jax.random.PRNGKey(0)

    # Small synthetic uint8 image batch, NCHW, 3 channels (RGB), 16x16.
    N, C, H, W = 2, 3, 16, 16
    img = jax.random.randint(key, (N, C, H, W), 0, 256, dtype=jnp.int32).astype(jnp.uint8)

    # ImageNet-style per-channel normalization parameters.
    mean = jnp.array([0.485, 0.456, 0.406], dtype=jnp.float32)
    std = jnp.array([0.229, 0.224, 0.225], dtype=jnp.float32)

    out = normalize_to_tensor(img, mean, std)
    out = jax.block_until_ready(out)

    # Reference check in plain JAX.
    ref = (img.astype(jnp.float32) * (1.0 / (255.0 * std))[None, :, None, None]
           - (mean / std)[None, :, None, None])
    assert out.shape == (N, C, H, W) and out.dtype == jnp.float32
    assert jnp.allclose(out, ref, atol=1e-5, rtol=1e-5)

    print("KERNEL_OK")
</pallas_src>

<mosaic_0001>
module attributes {stable_mosaic.version = 11 : i64} {
  func.func @_normalize_kernel(%arg0: i32, %arg1: i32, %arg2: memref<6x1xf32, #tpu.memory_space<vmem>>, %arg3: memref<6x1xf32, #tpu.memory_space<vmem>>, %arg4: memref<6x128xi8, #tpu.memory_space<vmem>>, %arg5: memref<6x128xf32, #tpu.memory_space<vmem>>) attributes {dimension_semantics = [#tpu.dimension_semantics<parallel>, #tpu.dimension_semantics<parallel>], iteration_bounds = array<i64: 1, 2>, scalar_prefetch = 0 : i64, scratch_operands = 0 : i64, tpu.core_type = #tpu.core_type<tc>, window_params = [{transform_indices = @transform_0, window_bounds = array<i64: 6, 1>}, {transform_indices = @transform_1, window_bounds = array<i64: 6, 1>}, {transform_indices = @transform_2, window_bounds = array<i64: 6, 128>}, {transform_indices = @transform_3, window_bounds = array<i64: 6, 128>}]} {
    %c0 = arith.constant 0 : index
    %c0_0 = arith.constant 0 : index
    %0 = vector.load %arg4[%c0, %c0_0] : memref<6x128xi8, #tpu.memory_space<vmem>>, vector<6x128xi8>
    %1 = arith.uitofp %0 : vector<6x128xi8> to vector<6x128xf32>
    %c0_1 = arith.constant 0 : index
    %c0_2 = arith.constant 0 : index
    %2 = vector.load %arg2[%c0_1, %c0_2] : memref<6x1xf32, #tpu.memory_space<vmem>>, vector<6x1xf32>
    %3 = vector.broadcast %2 : vector<6x1xf32> to vector<6x128xf32>
    %4 = arith.mulf %1, %3 : vector<6x128xf32>
    %c0_3 = arith.constant 0 : index
    %c0_4 = arith.constant 0 : index
    %5 = vector.load %arg3[%c0_3, %c0_4] : memref<6x1xf32, #tpu.memory_space<vmem>>, vector<6x1xf32>
    %6 = vector.broadcast %5 : vector<6x1xf32> to vector<6x128xf32>
    %7 = arith.subf %4, %6 : vector<6x128xf32>
    %c0_5 = arith.constant 0 : index
    %c0_6 = arith.constant 0 : index
    %8 = vector.load %arg5[%c0_5, %c0_6] : memref<6x128xf32, #tpu.memory_space<vmem>>, vector<6x128xf32>
    tpu.vector_store %arg5[%c0_5, %c0_6], %7 {strides = array<i32>} : memref<6x128xf32, #tpu.memory_space<vmem>>, vector<6x128xf32>,
    return
  }
  func.func @transform_0(%arg0: i32, %arg1: i32) -> (i32, i32) {
    %c0_i32 = arith.constant 0 : i32
    %c0_i32_0 = arith.constant 0 : i32
    return %arg0, %c0_i32 : i32, i32
  }
  func.func @transform_1(%arg0: i32, %arg1: i32) -> (i32, i32) {
    %c0_i32 = arith.constant 0 : i32
    %c0_i32_0 = arith.constant 0 : i32
    return %arg0, %c0_i32 : i32, i32
  }
  func.func @transform_2(%arg0: i32, %arg1: i32) -> (i32, i32) {
    %c0_i32 = arith.constant 0 : i32
    return %arg0, %arg1 : i32, i32
  }
  func.func @transform_3(%arg0: i32, %arg1: i32) -> (i32, i32) {
    %c0_i32 = arith.constant 0 : i32
    return %arg0, %arg1 : i32, i32
  }
}

</mosaic_0001>

<bundles_post_ra>
// kernel: tpu_custom_call.1
= control target key start
LH: loop header
LB: loop body
LE: loop exit
PB: predicated region body
PF: predicated region fallthrough
CT: control target
= control target key end

     0   :  { %8 = vsyncpa [#allocation3], 0  ;;  %s644_s0 = inlined_call_operand.vmem [shape: f32[6,1], index: 0, kind: input, shape index: {}]   ;;  %s645_s1 = inlined_call_operand.vmem [shape: f32[6,1], index: 1, kind: input, shape index: {}]   ;;  %s646_s2 = inlined_call_operand.vmem [shape: u8[6,256], index: 2, kind: input, shape index: {}]   ;;  %s647_s3 = inlined_call_operand.hbm [shape: f32[6,256], index: 3, kind: output, shape index: {}]  }
   0x1   :  { %10 = vsyncpa [#allocation3 + $0x1], 0  ;;  %s541_s12 = smov 0   ;;  %s543_s13 = smov 0  }
   0x2   :  { %s545_s14 = smov 0   ;;  %s547_s15 = smov 0  }
   0x3   :  { %s549_s16 = smov 0   ;;  %s551_s17 = smov 0  }
   0x4 LB: > { %s370_s18 = sadd.s32 4294967295, %s518_s17   ;;  %s371_s19 = sadd.s32 4294967294, %s518_s17   ;;  %s518_s17 = sphi %s551_s17, %s16_s17   ;;  %s514_s16 = sphi %s549_s16, %s654_s16   ;;  %s510_s15 = sphi %s547_s15, %s653_s15   ;;  %s506_s14 = sphi %s545_s14, %s652_s14   ;;  %s502_s13 = sphi %s543_s13, %s651_s13   ;;  %s498_s12 = sphi %s541_s12, %s650_s12  }
   0x5   : > { %s25_s20 = sadd.s32 1, %s514_s16  ;;  %s117_s21 = sadd.s32 1, %s506_s14 }
   0x6   : > { %p26_p0 = scmp.ge.s32.totalorder %s25_s20, 2  ;;  %p127_p1 = scmp.ne.s32.totalorder %s506_s14, %s502_s13 }
   0x7   : > { %p128_p2 = scmp.eq.s32.totalorder %s370_s18, 1  ;;  %p133_p3 = scmp.ne.s32.totalorder %s502_s13, %s498_s12 }
   0x8   : > { %s656_s20 = smov (%p26_p0, %s25_s20), 0  ;;  %p134_p5 = scmp.eq.s32.totalorder %s371_s19, 1 }
   0x9   : > { %p581_p4 = por %p128_p2, %p127_p1  ;;  %s113_s23 = ssub.s32 %s514_s16, %s656_s20 }
   0xa   : > { %p376_p6 = scmp.ge.s32.totalorder %s518_s17, 1  ;;  %p115_p7 = scmp.eq.s32.totalorder %s113_s23, 0 }
   0xb   : > { %p588_p8 = por %p134_p5, %p133_p3  ;;  %p177_p9 = scmp.lt.s32.totalorder %s518_s17, 3 }
   0xc   : > { %s594_s25 = scalar_select %p115_p7, %s506_s14, %s117_s21  }
   0xd   : > { %p178_p10 = pnand %p376_p6, %p177_p9 }
   0xe   : > { %p222_p11 = scmp.lt.s32.totalorder (!%p178_p10), %s510_s15, 1  ;;  %s209_s8 = sand.u32 (!%p178_p10), 1, %s502_s13  }
   0xf   : > { %181 = sbr.rel (%p178_p10) target bundleno = 150 (0x96), region = 32  ;;  %s377_s9 = sshll.u32 (!%p178_p10), %s209_s8, 3 }
  0x10   : > { %s380_s10 = sshll.u32 (!%p178_p10), %s510_s15, 3  ;;  %s211_s21 = scalar_lea.vmem (!%p178_p10), [#allocation2], %s377_s9 }
  0x11   : > { %s260_s19 = scalar_lea.hbm (!%p178_p10), %s647_s3, %s380_s10  ;;  %s262_s23 = sshll.u32 (!%p178_p10), %s211_s21, 4  ;;  %s263_s23 = int_to_ptr.vmem [resolvable:$true] %s262_s23 }
  0x12   : > { %s264_s26 = sshll.u32 (!%p178_p10), %s260_s19, 4  ;;  %s248_s27 = scalar_lea.sflag (!%p178_p10), [#allocation3], %s209_s8  ;;  %s265_s26 = int_to_ptr.hbm [resolvable:$true] %s264_s26 }
  0x13   : > { %s454_s28 = sshra.s32 (!%p178_p10), %s265_s26, 4  ;;  %s455_s28 = int_to_ptr.hbm [resolvable:$true] %s454_s28 }
  0x14   : > { %v232_v0 = vld [vmem:[%s644_s0] sm:$0x3f]  ;;  %v520_v1 = vmov 0   ;;  %s223_s30 = scalar_select %p222_p11, %s510_s15, 1 }
  0x15   : > { %439 = vset.pattern.permute.xlu0 %v520_v1  ;;  %v239_v2 = vld [vmem:[%s645_s1] sm:$0x3f]  ;;  %s456_s29 = scalar_lea.hbm %s455_s28, 8  ;;  %p461_p1 = scmp.lt.s32.totalorder %s455_s28, %s647_s3 }
  0x16   : > { %235 = vperm.xlu0 %439, %v232_v0   ;;  %s378_s4 = sshll.u32 %s223_s30, 1  ;;  %p457_p12 = scmp.ne.s32.totalorder %s455_s28, %s456_s29 }
  0x17   : > { %s227_s7 = scalar_lea.vmem %s646_s2, %s378_s4  ;;  %s460_s4 = scalar_lea.hbm %s647_s3, 16 }
  0x18   : > { %v228_v3 = vld [vmem:[%s227_s7] sm:$0x3]  ;;  %p458_p13 = pnand %p457_p12, %p581_p4  ;;  %p462_p2 = scmp.lt.s32.totalorder %s460_s4, %s456_s29 }
  0x19   : > { %v229_v4 = vunpack.c.0.s8 %v228_v3 }
  0x1a   : > { %p459_p0 = pneg %p458_p13  ;;  %p463_p3 = por %p462_p2, %p461_p1 }
  0x1b   : > { %v230_v5 = vand.u32 255, %v229_v4 }
  0x1c   : > { %p464_p5 = pnand %p463_p3, %p459_p0 }
  0x1d   : > { %v231_v7 = vcvt.s32.f32 %v230_v5 }
  0x1e   : > { %242 = vperm.xlu0 %439, %v239_v2  }
  0x88   : > { %v236_v6 = vpop.permute.xlu0 %235 }
  0x89   : > { %v238_v8 = vmul.f32 %v236_v6, %v231_v7 }
  0x90   : > { %v243_v9 = vpop.permute.xlu0 %242 }
  0x91   : > { %v245_v10 = vsub.f32 %v238_v8, %v243_v9 }
  0x93   : > { %246 = vst [vmem:[%s211_s21] sm:$0x3f] %v245_v10 }
  0x94   : > { %467 = shalt.err (!%p464_p5)
}
  0x95   : > { %383 = dma.vmem_to_hbm [thread:$0]  (%p581_p4), %s263_s23, 128, %s265_s26, %s248_s27  }
  0x96 PF: > { %p389_p6 = scmp.ge.s32.totalorder %s518_s17, 2  ;;  %s276_s7 = sand.u32 1, %s498_s12  }
  0x97   : > { %s277_s8 = scalar_lea.sflag [#allocation3], %s276_s7 }
  0x98   : > { %p386_p7 = pnand %p389_p6, %p588_p8 }
  0x9a   : > { %p387_p9 = pneg %p386_p7 }
  0x9c   : > { %493 = dma.done.wait (%p387_p9), %s277_s8, 128  }
  0x9d   : > { %495 = vsyncadd (%p387_p9), %s277_s8, 4294967168  ;;  %s16_s17 = sadd.s32 1, %s518_s17   ;;  %s650_s12 = smov %s502_s13 }
  0x9e   : > { %p13_p10 = scmp.ge.s32.totalorder %s16_s17, 4   ;;  %s651_s13 = smov %s506_s14 }
  0x9f   : > { %s652_s14 = smov %s594_s25  ;;  %s653_s15 = smov %s514_s16 }
  0xa0   : > { %s654_s16 = smov %s656_s20  ;;  %15 = sbr.rel (!%p13_p10) target bundleno = 4 (0x4), region = 73 }
  0xa5   :  { %283 = vsyncpa [#allocation3], 1 }
  0xa6   :  { %285 = vsyncpa [#allocation3 + $0x1], 1 }

</bundles_post_ra>
